<compile_context>
chip_gen: v7x
topology: tpu7x:2x2x1
jax: 0.10.0
libtpu: 0.0.40
codegen_flags: <defaults>
</compile_context>

<pallas_src>
import functools
import math

import jax
import jax.numpy as jnp
from jax.experimental import pallas as pl
from jax.experimental.pallas import tpu as pltpu


# ---------------------------------------------------------------------------
# Kernels
# ---------------------------------------------------------------------------

def _adain_resident_kernel(ab_ref, x_ref, o_ref, *, eps, inv_hw):
    """Whole-row-resident path: one (R, HW) block per grid step.

    ab_ref : (R, 2) f32  — column 0 = gamma, column 1 = beta
    x_ref / o_ref : (R, HW) activations, one row per (batch, channel)
    """
    x = x_ref[...].astype(jnp.float32)
    # Single sweep: accumulate sum and sum-of-squares, scale by 1/HW once.
    s1 = jnp.sum(x, axis=-1, keepdims=True)                 # (R, 1)
    s2 = jnp.sum(x * x, axis=-1, keepdims=True)             # (R, 1)
    mean = s1 * inv_hw
    var = jnp.maximum(s2 * inv_hw - mean * mean, 0.0)       # biased, clamped

    # Fold InstanceNorm + AdaIN affine into one FMA over the tile.
    a = ab_ref[:, 0:1] * jax.lax.rsqrt(var + eps)           # (R, 1)
    b = ab_ref[:, 1:2] - mean * a                           # (R, 1)
    # Re-index x_ref for the apply pass (VMEM reload is ~free; avoids keeping
    # the whole f32 tile live across the reduction and the apply).
    o_ref[...] = (x_ref[...].astype(jnp.float32) * a + b).astype(o_ref.dtype)


def _adain_chunked_kernel(ab_ref, x_ref, o_ref, stat_ref, *, eps, inv_hw, n_hw):
    """HW-chunked two-pass streaming path for large spatial extents.

    grid = (row_tiles, 2 * n_hw); j < n_hw: stats accumulation over chunks,
    j >= n_hw: apply pass over the same chunks (second HBM read of x).
    stat_ref : (R, 2) f32 VMEM scratch — column 0 = sum, column 1 = sumsq.
    """
    j = pl.program_id(1)

    @pl.when(j == 0)
    def _init():
        stat_ref[...] = jnp.zeros_like(stat_ref)

    @pl.when(j < n_hw)
    def _accumulate():
        x = x_ref[...].astype(jnp.float32)
        stat_ref[:, 0:1] += jnp.sum(x, axis=-1, keepdims=True)
        stat_ref[:, 1:2] += jnp.sum(x * x, axis=-1, keepdims=True)

    @pl.when(j >= n_hw)
    def _apply():
        mean = stat_ref[:, 0:1] * inv_hw
        var = jnp.maximum(stat_ref[:, 1:2] * inv_hw - mean * mean, 0.0)
        a = ab_ref[:, 0:1] * jax.lax.rsqrt(var + eps)
        b = ab_ref[:, 1:2] - mean * a
        o_ref[...] = (x_ref[...].astype(jnp.float32) * a + b).astype(o_ref.dtype)


# ---------------------------------------------------------------------------
# Wrapper
# ---------------------------------------------------------------------------

def _pick_hw_chunk(hw, tile_rows, itemsize, target_block_bytes):
    """Largest multiple-of-128 divisor of hw whose block fits the target."""
    max_chunk = target_block_bytes // max(1, tile_rows * itemsize)
    c = min(hw, (max_chunk // 128) * 128)
    while c >= 128:
        if hw % c == 0:
            return c
        c -= 128
    return None


def adaptive_instance_norm(x, style, weight, bias, *, eps=1e-5,
                           _force_chunked=False, _target_block_bytes=None):
    """x: (B, C, H, W) NCHW; style: (B, S); weight: (2C, S); bias: (2C,)."""
    B, C, H, W = x.shape
    S = style.shape[1]
    HW = H * W
    rows = B * C

    # --- Equalized-LR style linear, hoisted out of the kernel (tiny matmul,
    # <1% MXU utilization; plain XLA handles it once per call). ---
    scale = math.sqrt(2.0 / S)  # fan_in = in_dim * 1 for Linear
    y = (
        style.astype(jnp.float32) @ (weight.astype(jnp.float32).T * scale)
        + bias.astype(jnp.float32)
    )  # (B, 2C)
    gamma = y[:, :C].reshape(rows)
    beta = y[:, C:].reshape(rows)

    # --- Small-spatial stages (4x4 / 8x8): lane width < 128 would force
    # masked vst.msk partial stores; plain XLA is the better codegen. ---
    if HW < 128:
        g = gamma.reshape(B, C, 1, 1)
        b = beta.reshape(B, C, 1, 1)
        xf = x.astype(jnp.float32)
        mean = jnp.mean(xf, axis=(2, 3), keepdims=True)
        var = jnp.mean((xf - mean) ** 2, axis=(2, 3), keepdims=True)
        norm = (xf - mean) * jax.lax.rsqrt(var + eps)
        return (g * norm + b).astype(x.dtype)

    ab = jnp.stack([gamma, beta], axis=1)  # (rows, 2) f32, one side input
    x2 = x.reshape(rows, HW)               # row-dense: one row per (b, c)
    itemsize = jnp.dtype(x.dtype).itemsize

    # --- Generation-aware block / VMEM-limit sizing. ---
    try:
        vmem_cap = int(pltpu.get_tpu_info().vmem_capacity_bytes)
    except Exception:  # interpret mode / API drift
        vmem_cap = 128 * 1024 * 1024
    if vmem_cap >= 100 * 1024 * 1024:          # v5e / v6e: 128 MiB physical
        target_block_bytes = 8 * 1024 * 1024
        vmem_limit = 64 * 1024 * 1024
    else:                                      # v7x: 64 MiB physical
        target_block_bytes = 5 * 1024 * 1024
        vmem_limit = 48 * 1024 * 1024
    if _target_block_bytes is not None:
        target_block_bytes = _target_block_bytes

    # Sublane packing factor per dtype (f32: 8, bf16/f16: 16, int8/fp8: 32).
    sub = {4: 8, 2: 16, 1: 32}.get(itemsize, 8)

    def _cap_for_megacore(tr):
        # Keep the parallel row axis >= 2 grid steps so both v7x TensorCores
        # get work (no-op cost on single-TC v5e/v6e).
        half = (rows // 2) // sub * sub
        return min(tr, half) if half >= sub else tr

    row_bytes = HW * itemsize
    # 2x in + 2x out pipelined buffers for the smallest legal row tile.
    resident_fits = 4 * (min(rows, sub) * row_bytes) <= (3 * vmem_limit) // 4

    if resident_fits and not _force_chunked:
        # ------------------ whole-row-resident path (1 HBM read) ------------
        if rows <= sub:
            tile_rows = rows
        else:
            tile_rows = max(sub, (target_block_bytes // row_bytes) // sub * sub)
            tile_rows = min(tile_rows, (rows // sub) * sub)
            tile_rows = _cap_for_megacore(tile_rows)
        grid = (pl.cdiv(rows, tile_rows),)  # ragged last block masked by Pallas
        kernel = functools.partial(_adain_resident_kernel, eps=eps, inv_hw=1.0 / HW)
        out = pl.pallas_call(
            kernel,
            out_shape=jax.ShapeDtypeStruct((rows, HW), x.dtype),
            grid=grid,
            in_specs=[
                pl.BlockSpec((tile_rows, 2), lambda i: (i, 0)),    # gamma|beta
                pl.BlockSpec((tile_rows, HW), lambda i: (i, 0)),   # x rows
            ],
            out_specs=pl.BlockSpec((tile_rows, HW), lambda i: (i, 0)),
            compiler_params=pltpu.CompilerParams(
                dimension_semantics=("parallel",),
                vmem_limit_bytes=vmem_limit,
            ),
        )(ab, x2)
        return out.reshape(B, C, H, W)

    # ------------------ HW-chunked two-pass streaming path ------------------
    if rows <= sub:
        tile_rows = rows
    else:
        tile_rows = min((rows // sub) * sub, 4 * sub)
        tile_rows = _cap_for_megacore(tile_rows)
    hw_chunk = _pick_hw_chunk(HW, tile_rows, itemsize, target_block_bytes)
    if hw_chunk is None:
        # TODO(synk): ragged-HW streaming (mask the tail chunk in the stats
        # pass) for spatial extents with no multiple-of-128 divisor.
        hw_chunk = HW
    n_hw = HW // hw_chunk
    grid = (pl.cdiv(rows, tile_rows), 2 * n_hw)
    kernel = functools.partial(
        _adain_chunked_kernel, eps=eps, inv_hw=1.0 / HW, n_hw=n_hw)

    def x_map(i, j):
        return (i, j % n_hw)                 # same chunks in both phases

    def o_map(i, j):
        return (i, jnp.maximum(j - n_hw, 0))  # resident during stats phase

    out = pl.pallas_call(
        kernel,
        out_shape=jax.ShapeDtypeStruct((rows, HW), x.dtype),
        grid=grid,
        in_specs=[
            pl.BlockSpec((tile_rows, 2), lambda i, j: (i, 0)),     # gamma|beta
            pl.BlockSpec((tile_rows, hw_chunk), x_map),            # x chunks
        ],
        out_specs=pl.BlockSpec((tile_rows, hw_chunk), o_map),
        scratch_shapes=[pltpu.VMEM((tile_rows, 2), jnp.float32)],  # sum|sumsq
        compiler_params=pltpu.CompilerParams(
            dimension_semantics=("parallel", "arbitrary"),
            vmem_limit_bytes=vmem_limit,
        ),
    )(ab, x2)
    return out.reshape(B, C, H, W)


def adaptive_instance_norm_ref(x, style, weight, bias, *, eps=1e-5):
    """Pure-JAX reference matching the PyTorch forward."""
    B, C, H, W = x.shape
    S = style.shape[1]
    scale = math.sqrt(2.0 / S)
    y = style @ (weight * scale).T + bias          # (B, 2C)
    gamma = y[:, :C][:, :, None, None]
    beta = y[:, C:][:, :, None, None]
    mean = jnp.mean(x, axis=(2, 3), keepdims=True)
    var = jnp.mean((x - mean) ** 2, axis=(2, 3), keepdims=True)
    norm = (x - mean) / jnp.sqrt(var + eps)
    return gamma * norm + beta


if __name__ == "__main__":
    key = jax.random.PRNGKey(0)
    kx, ks, kw, kx2 = jax.random.split(key, 4)

    B, C, H, W = 2, 4, 16, 16
    style_dim = 8

    x = jax.random.normal(kx, (B, C, H, W), dtype=jnp.float32)
    style = jax.random.normal(ks, (B, style_dim), dtype=jnp.float32)

    # EqualizedLinear init: weight ~ N(0,1), bias[:C] = 1, bias[C:] = 0.
    weight = jax.random.normal(kw, (2 * C, style_dim), dtype=jnp.float32)
    bias = jnp.concatenate(
        [jnp.ones((C,), jnp.float32), jnp.zeros((C,), jnp.float32)]
    )

    # --- default (whole-row-resident) path ---
    out = adaptive_instance_norm(x, style, weight, bias)
    out = jax.block_until_ready(out)
    ref = adaptive_instance_norm_ref(x, style, weight, bias)
    assert out.shape == (B, C, H, W)
    assert jnp.allclose(out, ref, atol=1e-4, rtol=1e-4), "resident path mismatch"

    # --- HW-chunked streaming path (forced, small shapes) ---
    H2 = W2 = 32
    x_big = jax.random.normal(kx2, (B, C, H2, W2), dtype=jnp.float32)
    out_c = adaptive_instance_norm(
        x_big, style, weight, bias,
        _force_chunked=True, _target_block_bytes=8 * 1024)
    out_c = jax.block_until_ready(out_c)
    ref_c = adaptive_instance_norm_ref(x_big, style, weight, bias)
    assert jnp.allclose(out_c, ref_c, atol=1e-4, rtol=1e-4), "chunked path mismatch"

    print("KERNEL_OK")
</pallas_src>

<mosaic_0001>
module attributes {stable_mosaic.version = 11 : i64} {
  func.func @_adain_resident_kernel(%arg0: i32, %arg1: memref<8x2xf32, #tpu.memory_space<vmem>>, %arg2: memref<8x256xf32, #tpu.memory_space<vmem>>, %arg3: memref<8x256xf32, #tpu.memory_space<vmem>>) attributes {dimension_semantics = [#tpu.dimension_semantics<parallel>], iteration_bounds = array<i64: 1>, scalar_prefetch = 0 : i64, scratch_operands = 0 : i64, tpu.core_type = #tpu.core_type<tc>, window_params = [{transform_indices = @transform_0, window_bounds = array<i64: 8, 2>}, {transform_indices = @transform_1, window_bounds = array<i64: 8, 256>}, {transform_indices = @transform_2, window_bounds = array<i64: 8, 256>}]} {
    %c0 = arith.constant 0 : index
    %c0_0 = arith.constant 0 : index
    %0 = vector.load %arg2[%c0, %c0_0] : memref<8x256xf32, #tpu.memory_space<vmem>>, vector<8x256xf32>
    %cst = arith.constant dense<0.000000e+00> : vector<8xf32>
    %1 = vector.multi_reduction <add>, %0, %cst [1] : vector<8x256xf32> to vector<8xf32>
    %2 = vector.shape_cast %1 : vector<8xf32> to vector<8x1xf32>
    %3 = arith.mulf %0, %0 : vector<8x256xf32>
    %cst_1 = arith.constant dense<0.000000e+00> : vector<8xf32>
    %4 = vector.multi_reduction <add>, %3, %cst_1 [1] : vector<8x256xf32> to vector<8xf32>
    %5 = vector.shape_cast %4 : vector<8xf32> to vector<8x1xf32>
    %cst_2 = arith.constant 3.906250e-03 : f32
    %6 = vector.broadcast %cst_2 : f32 to vector<8x1xf32>
    %7 = arith.mulf %2, %6 : vector<8x1xf32>
    %cst_3 = arith.constant 3.906250e-03 : f32
    %8 = vector.broadcast %cst_3 : f32 to vector<8x1xf32>
    %9 = arith.mulf %5, %8 : vector<8x1xf32>
    %10 = arith.mulf %7, %7 : vector<8x1xf32>
    %11 = arith.subf %9, %10 : vector<8x1xf32>
    %cst_4 = arith.constant 0.000000e+00 : f32
    %12 = vector.broadcast %cst_4 : f32 to vector<8x1xf32>
    %13 = arith.maximumf %11, %12 : vector<8x1xf32>
    %c0_5 = arith.constant 0 : index
    %c0_6 = arith.constant 0 : index
    %14 = vector.load %arg1[%c0_5, %c0_6] : memref<8x2xf32, #tpu.memory_space<vmem>>, vector<8x1xf32>
    %cst_7 = arith.constant 9.99999974E-6 : f32
    %15 = vector.broadcast %cst_7 : f32 to vector<8x1xf32>
    %16 = arith.addf %13, %15 : vector<8x1xf32>
    %17 = math.rsqrt %16 : vector<8x1xf32>
    %18 = arith.mulf %14, %17 : vector<8x1xf32>
    %c0_8 = arith.constant 0 : index
    %c1 = arith.constant 1 : index
    %19 = vector.load %arg1[%c0_8, %c1] : memref<8x2xf32, #tpu.memory_space<vmem>>, vector<8x1xf32>
    %20 = arith.mulf %7, %18 : vector<8x1xf32>
    %21 = arith.subf %19, %20 : vector<8x1xf32>
    %c0_9 = arith.constant 0 : index
    %c0_10 = arith.constant 0 : index
    %22 = vector.load %arg2[%c0_9, %c0_10] : memref<8x256xf32, #tpu.memory_space<vmem>>, vector<8x256xf32>
    %23 = vector.broadcast %18 : vector<8x1xf32> to vector<8x256xf32>
    %24 = arith.mulf %22, %23 : vector<8x256xf32>
    %25 = vector.broadcast %21 : vector<8x1xf32> to vector<8x256xf32>
    %26 = arith.addf %24, %25 : vector<8x256xf32>
    %c0_11 = arith.constant 0 : index
    %c0_12 = arith.constant 0 : index
    %27 = vector.load %arg3[%c0_11, %c0_12] : memref<8x256xf32, #tpu.memory_space<vmem>>, vector<8x256xf32>
    tpu.vector_store %arg3[%c0_11, %c0_12], %26 {strides = array<i32>} : memref<8x256xf32, #tpu.memory_space<vmem>>, vector<8x256xf32>,
    return
  }
  func.func @transform_0(%arg0: i32) -> (i32, i32) {
    %c0_i32 = arith.constant 0 : i32
    %c0_i32_0 = arith.constant 0 : i32
    return %arg0, %c0_i32 : i32, i32
  }
  func.func @transform_1(%arg0: i32) -> (i32, i32) {
    %c0_i32 = arith.constant 0 : i32
    %c0_i32_0 = arith.constant 0 : i32
    return %arg0, %c0_i32 : i32, i32
  }
  func.func @transform_2(%arg0: i32) -> (i32, i32) {
    %c0_i32 = arith.constant 0 : i32
    %c0_i32_0 = arith.constant 0 : i32
    return %arg0, %c0_i32 : i32, i32
  }
}

</mosaic_0001>

<bundles_post_ra>
// kernel: tpu_custom_call.1
= control target key start
LH: loop header
LB: loop body
LE: loop exit
PB: predicated region body
PF: predicated region fallthrough
CT: control target
= control target key end

     0   :  { %7 = vsyncpa [#allocation3], 0  ;;  %s232_s0 = inlined_call_operand.hbm [shape: f32[8,2], index: 0, kind: input, shape index: {}]   ;;  %s233_s1 = inlined_call_operand.hbm [shape: f32[8,256], index: 1, kind: input, shape index: {}]   ;;  %s234_s2 = inlined_call_operand.hbm [shape: f32[8,256], index: 2, kind: output, shape index: {}]  }
   0x1   :  { %8 = vsyncpa [#allocation6], 0 }
   0x2   :  { %9 = vsyncpa [#allocation4], 0  ;;  %s175_s9 = smov [#allocation2]   ;;  %s176_s11 = smov [#allocation5]  }
   0x3   :  { %s16_s10 = sshll.u32 %s175_s9, 4  ;;  %s26_s12 = sshll.u32 %s176_s11, 4  ;;  %s17_s10 = int_to_ptr.vmem [resolvable:$true] %s16_s10  ;;  %s27_s12 = int_to_ptr.vmem [resolvable:$true] %s26_s12 }
   0x4   :  { %s103_s15 = scalar_lea.hbm %s232_s0, 128 }
   0x5   :  { %p104_p0 = scmp.ne.s32.totalorder %s232_s0, %s103_s15  ;;  %p107_p1 = scmp.lt.u32.totalorder %s103_s15, %s232_s0 }
   0x7   :  { %p109_p2 = pnand %p107_p1, %p104_p0 }
   0x9   :  { %112 = shalt.err (!%p109_p2)
}
   0xa   :  { %s113_s20 = scalar_lea.vmem %s17_s10, 128  ;;  %p118_p4 = scmp.lt.s32.totalorder %s17_s10, %s17_s10 }
   0xb   :  { %p114_p3 = scmp.ne.s32.totalorder %s17_s10, %s113_s20  ;;  %p119_p5 = scmp.lt.s32.totalorder %s113_s20, %s113_s20 }
   0xd   :  { %p120_p6 = por %p119_p5, %p118_p4 }
   0xf   :  { %p121_p7 = pnand %p120_p6, %p114_p3 }
  0x11   :  { %124 = shalt.err (!%p121_p7)
}
  0x12   :  { %19 = dma.hbm_to_vmem [thread:$0]  %s232_s0, 128, %s17_s10, [#allocation3]  }
  0x13   :  { %s125_s25 = scalar_lea.hbm %s233_s1, 256 }
  0x14   :  { %p126_p8 = scmp.ne.s32.totalorder %s233_s1, %s125_s25  ;;  %p129_p9 = scmp.lt.u32.totalorder %s125_s25, %s233_s1 }
  0x16   :  { %p131_p10 = pnand %p129_p9, %p126_p8 }
  0x18   :  { %134 = shalt.err (!%p131_p10)
}
  0x19   :  { %s135_s30 = scalar_lea.vmem %s27_s12, 256  ;;  %p140_p12 = scmp.lt.s32.totalorder %s27_s12, %s27_s12 }
  0x1a   :  { %p136_p11 = scmp.ne.s32.totalorder %s27_s12, %s135_s30  ;;  %p141_p13 = scmp.lt.s32.totalorder %s135_s30, %s135_s30 }
  0x1c   :  { %p142_p0 = por %p141_p13, %p140_p12 }
  0x1e   :  { %p143_p1 = pnand %p142_p0, %p136_p11 }
  0x20   :  { %146 = shalt.err (!%p143_p1)
}
  0x21   :  { %29 = dma.hbm_to_vmem [thread:$0]  %s233_s1, 256, %s27_s12, [#allocation6]  }
  0x22   :  { %169 = dma.done.wait [#allocation3], 128  }
  0x23   :  { %170 = vsyncadd [#allocation3], 4294967168 }
  0x24   :  { %171 = dma.done.wait [#allocation6], 256  }
  0x25   :  { %172 = vsyncadd [#allocation6], 4294967040  ;;  %v36_v0 = vld [vmem:[#allocation5] sm:$0xff]  ;;  %v37_v1 = vld [vmem:[#allocation5 + $0x8] sm:$0xff]  ;;  %v177_v6 = vmov 0   ;;  %v178_v15 = vmov 1  }
  0x26   :  { %v38_v2 = vadd.f32 %v37_v1, %v36_v0  ;;  %v41_v3 = vmul.f32 %v36_v0, %v36_v0  ;;  %v42_v4 = vmul.f32 %v37_v1, %v37_v1  ;;  %99 = vset.pattern.permute.xlu1 %v177_v6  ;;  %100 = vset.pattern.permute.xlu0 %v178_v15  ;;  %v51_v16 = vld [vmem:[#allocation2] sm:$0xff]  ;;  %s179_s1 = smov 1   ;;  %s180_s4 = smov [#allocation7]  }
  0x27   :  { %s83_s5 = sshll.u32 %s180_s4, 4  ;;  %s84_s5 = int_to_ptr.vmem [resolvable:$true] %s83_s5 }
  0x28   :  { %39 = vadd.xlane.f32.xlu0 %v38_v2  ;;  %v43_v5 = vadd.f32 %v42_v4, %v41_v3  ;;  %s147_s6 = scalar_lea.vmem %s84_s5, 256  ;;  %p152_p3 = scmp.lt.s32.totalorder %s84_s5, %s84_s5 }
  0x29   :  { %p148_p2 = scmp.ne.s32.totalorder %s84_s5, %s147_s6  ;;  %p153_p4 = scmp.lt.s32.totalorder %s147_s6, %s147_s6 }
  0x2b   :  { %p154_p5 = por %p153_p4, %p152_p3 }
  0x2c   :  { %44 = vadd.xlane.f32.xlu0 %v43_v5 }
  0x2d   :  { %p155_p6 = pnand %p154_p5, %p148_p2 }
  0xb5   :  { %v40_v7 = vpop.xlane.xlu0 %39 }
  0xb6   :  { %v46_v8 = vmul.f32 0.00390625, %v40_v7 }
  0xb8   :  { %v48_v10 = vmul.f32 %v46_v8, %v46_v8 }
  0xb9   :  { %v45_v9 = vpop.xlane.xlu0 %44 }
  0xba   :  { %v47_v11 = vmul.f32 0.00390625, %v45_v9 }
  0xbc   :  { %v49_v12 = vsub.f32 %v47_v11, %v48_v10 }
  0xbe   :  { %v50_v13 = vmax.f32 %v49_v12, 0.0 }
  0xc0   :  { %v52_v14 = vadd.f32 1e-05, %v50_v13 }
  0xc2   :  { %101 = vrsqrt.f32 %v52_v14 }
  0xcc   :  { %v102_v17 = vpop.eup %101 }
  0xcd   :  { %v54_v18 = vmul.f32 %v102_v17, %v51_v16 }
  0xcf   :  { %v55_v19 = vmul.f32 %v54_v18, %v46_v8 }
  0xd1   :  { %57 = vrot.lane.b32.xlu1 %v55_v19, %s179_s1 }
  0xd5   :  { %63 = vperm.xlu1 %99, %v54_v18  }
 0x143   :  { %v58_v20 = vpop.permute.xlu1 %57 }
 0x144   :  { %v60_v21 = vsub.f32 %v51_v16, %v58_v20 }
 0x146   :  { %70 = vperm.xlu0 %100, %v60_v21  }
 0x154   :  { %v64_v22 = vpop.permute.xlu1 %63 }
 0x155   :  { %v66_v23 = vmul.f32 %v64_v22, %v36_v0  ;;  %v67_v24 = vmul.f32 %v64_v22, %v37_v1 }
 0x1c5   :  { %v71_v25 = vpop.permute.xlu0 %70 }
 0x1c6   :  { %v73_v26 = vadd.f32 %v71_v25, %v66_v23  ;;  %v74_v27 = vadd.f32 %v71_v25, %v67_v24 }
 0x1c8   :  { %75 = vst [vmem:[#allocation7] sm:$0xff] %v73_v26  ;;  %76 = vst [vmem:[#allocation7 + $0x8] sm:$0xff] %v74_v27 }
 0x1c9   :  { %158 = shalt.err (!%p155_p6)
}
 0x1ca   :  { %s159_s9 = scalar_lea.hbm %s234_s2, 256 }
 0x1cb   :  { %p160_p7 = scmp.ne.s32.totalorder %s234_s2, %s159_s9  ;;  %p163_p8 = scmp.lt.u32.totalorder %s159_s9, %s234_s2 }
 0x1cd   :  { %p165_p9 = pnand %p163_p8, %p160_p7 }
 0x1cf   :  { %168 = shalt.err (!%p165_p9)
}
 0x1d0   :  { %86 = dma.vmem_to_hbm [thread:$0]  %s84_s5, 256, %s234_s2, [#allocation4]  }
 0x1d1   :  { %173 = dma.done.wait [#allocation4], 256  }
 0x1d2   :  { %174 = vsyncadd [#allocation4], 4294967040 }
 0x1d3   :  { %90 = vsyncpa [#allocation3], 1 }
 0x1d4   :  { %91 = vsyncpa [#allocation6], 1 }
 0x1d5   :  { %92 = vsyncpa [#allocation4], 1 }

</bundles_post_ra>
